<compile_context>
chip_gen: v5e
topology: v5e:2x2
jax: 0.10.0
libtpu: 0.0.40
codegen_flags: <defaults>
</compile_context>

<pallas_src>
import functools
import math

import jax
import jax.numpy as jnp
from jax import lax
from jax.experimental import pallas as pl
from jax.experimental.pallas import tpu as pltpu


def _logit_warper_kernel(top_k, inv_temp, filter_value,
                         logits_ref, probs_ref, idx_ref):
    """One tile of independent rows.

    logits_ref : (TB, V)        input logits
    probs_ref  : (TB, V)        output probabilities (same dtype as input)
    idx_ref    : (TB, IDX_PAD)  top-k indices in columns [0, K), descending
    """
    x = logits_ref[...].astype(jnp.float32)                      # (TB, V)
    tb, v = x.shape
    idx_pad = idx_ref.shape[-1]
    col_ids = lax.broadcasted_iota(jnp.int32, (tb, v), 1)
    out_lane = lax.broadcasted_iota(jnp.int32, (tb, idx_pad), 1)
    neg_inf = jnp.float32(-jnp.inf)
    sentinel = jnp.int32(v)

    # ---- iterative top-k ----------------------------------------------------
    # `work`     : values, already-picked entries forced to -inf (for the max)
    # `col_live` : column id, or V once picked.  Tracking liveness separately
    #   keeps the k indices distinct even when a row holds fewer than k finite
    #   logits (the -inf sentinel alone would re-match removed positions).
    def body(i, carry):
        work, col_live, m0, kth, idx_acc = carry
        m = jnp.max(work, axis=-1, keepdims=True)                 # (TB, 1)
        hit = work >= m
        sel = jnp.min(jnp.where(hit, col_live, sentinel),
                      axis=-1, keepdims=True)                     # (TB, 1) int32
        picked = col_ids == sel
        work = jnp.where(picked, neg_inf, work)
        col_live = jnp.where(picked, sentinel, col_live)
        idx_acc = jnp.where(out_lane == i, sel, idx_acc)          # cheap: 128 lanes
        m0 = jnp.where(i == 0, m, m0)                             # row max of x
        return work, col_live, m0, m, idx_acc

    init = (x, col_ids,
            jnp.full((tb, 1), neg_inf, jnp.float32),
            jnp.full((tb, 1), neg_inf, jnp.float32),
            jnp.zeros((tb, idx_pad), jnp.int32))
    # TODO(synk): for very large top_k a bitwise threshold search on the value
    # bits (O(32) row passes) would beat this O(k) loop.
    _, _, m0, kth_val, idx_acc = lax.fori_loop(
        0, top_k, body, init, unroll=(top_k <= 8))

    idx_ref[...] = idx_acc                         # single lane-dense store

    # ---- temperature + top-k mask + softmax (fused single pass) -------------
    # torch: probs = softmax(masked_fill(logits/temperature, logits < kth, fv))
    keep = x >= kth_val
    row_max = m0 * inv_temp          # == max of kept scaled logits (temperature > 0)
    if math.isfinite(filter_value):  # trace-time branch
        fv = jnp.float32(filter_value)
        row_max = jnp.maximum(row_max, fv)
        e = jnp.where(keep, jnp.exp(x * inv_temp - row_max), jnp.exp(fv - row_max))
    else:
        e = jnp.where(keep, jnp.exp(x * inv_temp - row_max), jnp.float32(0.0))
    row_sum = jnp.sum(e, axis=-1, keepdims=True)
    inv = pl.reciprocal(row_sum, approx=True)      # EUP slot, (TB, 1)
    inv = inv * (2.0 - row_sum * inv)              # two Newton steps on (TB,1):
    inv = inv * (2.0 - row_sum * inv)              # ~free, restores f32 accuracy
    probs = e * inv
    if probs.dtype != probs_ref.dtype:             # trace-time check
        probs = probs.astype(probs_ref.dtype)
    probs_ref[...] = probs


def _pick_block_rows(batch, vocab, block_rows):
    """Row-tile: as large as the VMEM budget allows, a multiple of 8 rows, and
    >=2 grid steps when batch >= 16 (so both v7x TensorCores get work)."""
    if batch <= 8:
        return batch                                # single block, full extent
    budget = 40 << 20                               # ~10 live (TB,V) f32 buffers
    cap = max(8, (budget // (10 * vocab * 4)) // 8 * 8)
    tb = min(block_rows, cap, max(8, (batch // 2) // 8 * 8))
    return max(8, (tb // 8) * 8)


def custom_logit_warper(logits, top_k, temperature,
                        filter_value=-float("inf"), block_rows=32):
    """Pallas equivalent of CustomLogitWarper.forward. Returns (probs, indices)."""
    *lead, vocab = logits.shape
    top_k = int(top_k)
    assert 1 <= top_k <= vocab, "top_k must be in [1, vocab]"
    assert temperature > 0, "temperature must be > 0"
    batch = int(math.prod(lead)) if lead else 1
    x2d = logits.reshape(batch, vocab)

    tb = _pick_block_rows(batch, vocab, block_rows)
    grid = (pl.cdiv(batch, tb),)                    # ragged last block is masked
    idx_pad = ((top_k + 127) // 128) * 128          # lane-dense index store

    kernel = functools.partial(_logit_warper_kernel, top_k,
                               float(1.0 / temperature), float(filter_value))
    itemsize = jnp.dtype(logits.dtype).itemsize
    cost = pl.CostEstimate(
        flops=int((4 * top_k + 8) * batch * vocab),
        transcendentals=int(batch * vocab),
        bytes_accessed=int(2 * batch * vocab * itemsize + batch * idx_pad * 4))
    vmem_limit = int(min(64 << 20, max(32 << 20, 12 * tb * vocab * 4)))

    probs, idx = pl.pallas_call(
        kernel,
        out_shape=(
            jax.ShapeDtypeStruct((batch, vocab), logits.dtype),
            # TODO(synk): torch.topk returns int64 indices; int32 used here.
            jax.ShapeDtypeStruct((batch, idx_pad), jnp.int32),
        ),
        grid=grid,
        in_specs=[pl.BlockSpec((tb, vocab), lambda i: (i, 0))],
        out_specs=(pl.BlockSpec((tb, vocab), lambda i: (i, 0)),
                   pl.BlockSpec((tb, idx_pad), lambda i: (i, 0))),
        compiler_params=pltpu.CompilerParams(
            dimension_semantics=("parallel",),
            vmem_limit_bytes=vmem_limit),
        cost_estimate=cost,
    )(x2d)

    probs = probs.reshape(*lead, vocab)
    idx = idx[:, :top_k].reshape(*lead, top_k)
    return probs, idx


class CustomLogitWarper:
    """Mirror of the PyTorch module: Temperature + TopK mask + Softmax."""

    def __init__(self, top_k, temperature, filter_value=-float("inf")):
        self.top_k = top_k
        self.temperature = temperature
        self.filter_value = filter_value

    def __call__(self, logits):
        return custom_logit_warper(logits, self.top_k, self.temperature,
                                   self.filter_value)


if __name__ == "__main__":
    # --- Test 1: small single-block case, unrolled top-k loop ----------------
    key = jax.random.PRNGKey(0)
    batch, vocab = 2, 512
    top_k, temperature = 4, 0.8
    logits = jax.random.normal(key, (batch, vocab), dtype=jnp.float32)

    warper = CustomLogitWarper(top_k=top_k, temperature=temperature)
    probs, idx = jax.block_until_ready(warper(logits))

    ref_top, ref_idx = lax.top_k(logits, top_k)
    kth = ref_top[..., -1:]
    ref_probs = jax.nn.softmax(
        jnp.where(logits < kth, -jnp.inf, logits / temperature), axis=-1)

    assert probs.shape == ref_probs.shape, (probs.shape, ref_probs.shape)
    assert idx.shape == ref_idx.shape, (idx.shape, ref_idx.shape)
    assert bool(jnp.allclose(probs, ref_probs, atol=1e-5, rtol=1e-4)), \
        "probs mismatch vs reference (test 1)"
    assert bool(jnp.all(idx == ref_idx.astype(jnp.int32))), \
        "top-k indices mismatch vs reference (test 1)"
    assert bool(jnp.allclose(probs.sum(-1), 1.0, atol=1e-5)), \
        "probs do not sum to 1 (test 1)"

    # --- Test 2: multi-step grid with ragged last block, rolled top-k loop,
    #             and a row with fewer finite logits than top_k ---------------
    batch2, vocab2, k2, temp2 = 20, 256, 20, 1.3
    x2 = jax.random.normal(jax.random.PRNGKey(1), (batch2, vocab2),
                           dtype=jnp.float32)
    x2 = x2.at[3, 3:].set(-jnp.inf)                 # row 3: only 3 finite logits
    probs2, idx2 = jax.block_until_ready(custom_logit_warper(x2, k2, temp2))

    ref_top2, _ = lax.top_k(x2, k2)
    kth2 = ref_top2[..., -1:]
    ref_probs2 = jax.nn.softmax(
        jnp.where(x2 < kth2, -jnp.inf, x2 / temp2), axis=-1)
    assert bool(jnp.allclose(probs2, ref_probs2, atol=1e-5, rtol=1e-4)), \
        "probs mismatch vs reference (test 2)"
    srt = jnp.sort(idx2, axis=-1)
    assert bool(jnp.all(srt[:, 1:] != srt[:, :-1])), \
        "duplicate top-k indices (test 2)"
    assert bool(jnp.all((idx2 >= 0) & (idx2 < vocab2))), \
        "top-k index out of range (test 2)"

    print("KERNEL_OK")
</pallas_src>

<mosaic_0001>
module attributes {stable_mosaic.version = 11 : i64} {
  func.func @_logit_warper_kernel(%arg0: i32, %arg1: memref<2x512xf32, #tpu.memory_space<vmem>>, %arg2: memref<2x512xf32, #tpu.memory_space<vmem>>, %arg3: memref<2x128xi32, #tpu.memory_space<vmem>>) attributes {dimension_semantics = [#tpu.dimension_semantics<parallel>], iteration_bounds = array<i64: 1>, scalar_prefetch = 0 : i64, scratch_operands = 0 : i64, tpu.core_type = #tpu.core_type<tc>, window_params = [{transform_indices = @transform_0, window_bounds = array<i64: 2, 512>}, {transform_indices = @transform_1, window_bounds = array<i64: 2, 512>}, {transform_indices = @transform_2, window_bounds = array<i64: 2, 128>}]} {
    %c0 = arith.constant 0 : index
    %c0_0 = arith.constant 0 : index
    %0 = vector.load %arg1[%c0, %c0_0] : memref<2x512xf32, #tpu.memory_space<vmem>>, vector<2x512xf32>
    %1 = tpu.iota {dimensions = array<i32: 1>} : vector<2x512xi32>
    %2 = tpu.iota {dimensions = array<i32: 1>} : vector<2x128xi32>
    %cst = arith.constant 0xFF800000 : f32
    %3 = vector.broadcast %cst : f32 to vector<2x1xf32>
    %cst_1 = arith.constant 0xFF800000 : f32
    %4 = vector.broadcast %cst_1 : f32 to vector<2x1xf32>
    %c0_i32 = arith.constant 0 : i32
    %5 = vector.broadcast %c0_i32 : i32 to vector<2x128xi32>
    %c512_i32 = arith.constant 512 : i32
    %cst_2 = arith.constant 0xFF800000 : f32
    %c0_i32_3 = arith.constant 0 : i32
    %cst_4 = arith.constant dense<0xFF800000> : vector<2xf32>
    %6 = vector.multi_reduction <maximumf>, %0, %cst_4 [1] : vector<2x512xf32> to vector<2xf32>
    %7 = vector.shape_cast %6 : vector<2xf32> to vector<2x1xf32>
    %8 = vector.broadcast %7 : vector<2x1xf32> to vector<2x512xf32>
    %9 = arith.cmpf oge, %0, %8 : vector<2x512xf32>
    %10 = vector.broadcast %c512_i32 : i32 to vector<2x512xi32>
    %11 = arith.select %9, %1, %10 : vector<2x512xi1>, vector<2x512xi32>
    %cst_5 = arith.constant dense<2147483647> : vector<2xi32>
    %12 = vector.multi_reduction <minsi>, %11, %cst_5 [1] : vector<2x512xi32> to vector<2xi32>
    %13 = vector.shape_cast %12 : vector<2xi32> to vector<2x1xi32>
    %14 = vector.broadcast %13 : vector<2x1xi32> to vector<2x512xi32>
    %15 = arith.cmpi eq, %1, %14 : vector<2x512xi32>
    %16 = vector.broadcast %cst_2 : f32 to vector<2x512xf32>
    %17 = arith.select %15, %16, %0 : vector<2x512xi1>, vector<2x512xf32>
    %18 = vector.broadcast %c512_i32 : i32 to vector<2x512xi32>
    %19 = arith.select %15, %18, %1 : vector<2x512xi1>, vector<2x512xi32>
    %20 = vector.broadcast %c0_i32_3 : i32 to vector<2x128xi32>
    %21 = arith.cmpi eq, %2, %20 : vector<2x128xi32>
    %22 = vector.shape_cast %13 : vector<2x1xi32> to vector<2x1xi32>
    %23 = vector.broadcast %22 : vector<2x1xi32> to vector<2x128xi32>
    %24 = arith.select %21, %23, %5 : vector<2x128xi1>, vector<2x128xi32>
    %c0_i32_6 = arith.constant 0 : i32
    %25 = arith.cmpi eq, %c0_i32_3, %c0_i32_6 : i32
    %26 = arith.select %25, %7, %3 : vector<2x1xf32>
    %c1_i32 = arith.constant 1 : i32
    %cst_7 = arith.constant dense<0xFF800000> : vector<2xf32>
    %27 = vector.multi_reduction <maximumf>, %17, %cst_7 [1] : vector<2x512xf32> to vector<2xf32>
    %28 = vector.shape_cast %27 : vector<2xf32> to vector<2x1xf32>
    %29 = vector.broadcast %28 : vector<2x1xf32> to vector<2x512xf32>
    %30 = arith.cmpf oge, %17, %29 : vector<2x512xf32>
    %31 = vector.broadcast %c512_i32 : i32 to vector<2x512xi32>
    %32 = arith.select %30, %19, %31 : vector<2x512xi1>, vector<2x512xi32>
    %cst_8 = arith.constant dense<2147483647> : vector<2xi32>
    %33 = vector.multi_reduction <minsi>, %32, %cst_8 [1] : vector<2x512xi32> to vector<2xi32>
    %34 = vector.shape_cast %33 : vector<2xi32> to vector<2x1xi32>
    %35 = vector.broadcast %34 : vector<2x1xi32> to vector<2x512xi32>
    %36 = arith.cmpi eq, %1, %35 : vector<2x512xi32>
    %37 = vector.broadcast %cst_2 : f32 to vector<2x512xf32>
    %38 = arith.select %36, %37, %17 : vector<2x512xi1>, vector<2x512xf32>
    %39 = vector.broadcast %c512_i32 : i32 to vector<2x512xi32>
    %40 = arith.select %36, %39, %19 : vector<2x512xi1>, vector<2x512xi32>
    %41 = vector.broadcast %c1_i32 : i32 to vector<2x128xi32>
    %42 = arith.cmpi eq, %2, %41 : vector<2x128xi32>
    %43 = vector.shape_cast %34 : vector<2x1xi32> to vector<2x1xi32>
    %44 = vector.broadcast %43 : vector<2x1xi32> to vector<2x128xi32>
    %45 = arith.select %42, %44, %24 : vector<2x128xi1>, vector<2x128xi32>
    %c0_i32_9 = arith.constant 0 : i32
    %46 = arith.cmpi eq, %c1_i32, %c0_i32_9 : i32
    %47 = arith.select %46, %28, %26 : vector<2x1xf32>
    %c2_i32 = arith.constant 2 : i32
    %cst_10 = arith.constant dense<0xFF800000> : vector<2xf32>
    %48 = vector.multi_reduction <maximumf>, %38, %cst_10 [1] : vector<2x512xf32> to vector<2xf32>
    %49 = vector.shape_cast %48 : vector<2xf32> to vector<2x1xf32>
    %50 = vector.broadcast %49 : vector<2x1xf32> to vector<2x512xf32>
    %51 = arith.cmpf oge, %38, %50 : vector<2x512xf32>
    %52 = vector.broadcast %c512_i32 : i32 to vector<2x512xi32>
    %53 = arith.select %51, %40, %52 : vector<2x512xi1>, vector<2x512xi32>
    %cst_11 = arith.constant dense<2147483647> : vector<2xi32>
    %54 = vector.multi_reduction <minsi>, %53, %cst_11 [1] : vector<2x512xi32> to vector<2xi32>
    %55 = vector.shape_cast %54 : vector<2xi32> to vector<2x1xi32>
    %56 = vector.broadcast %55 : vector<2x1xi32> to vector<2x512xi32>
    %57 = arith.cmpi eq, %1, %56 : vector<2x512xi32>
    %58 = vector.broadcast %cst_2 : f32 to vector<2x512xf32>
    %59 = arith.select %57, %58, %38 : vector<2x512xi1>, vector<2x512xf32>
    %60 = vector.broadcast %c512_i32 : i32 to vector<2x512xi32>
    %61 = arith.select %57, %60, %40 : vector<2x512xi1>, vector<2x512xi32>
    %62 = vector.broadcast %c2_i32 : i32 to vector<2x128xi32>
    %63 = arith.cmpi eq, %2, %62 : vector<2x128xi32>
    %64 = vector.shape_cast %55 : vector<2x1xi32> to vector<2x1xi32>
    %65 = vector.broadcast %64 : vector<2x1xi32> to vector<2x128xi32>
    %66 = arith.select %63, %65, %45 : vector<2x128xi1>, vector<2x128xi32>
    %c0_i32_12 = arith.constant 0 : i32
    %67 = arith.cmpi eq, %c2_i32, %c0_i32_12 : i32
    %68 = arith.select %67, %49, %47 : vector<2x1xf32>
    %c3_i32 = arith.constant 3 : i32
    %cst_13 = arith.constant dense<0xFF800000> : vector<2xf32>
    %69 = vector.multi_reduction <maximumf>, %59, %cst_13 [1] : vector<2x512xf32> to vector<2xf32>
    %70 = vector.shape_cast %69 : vector<2xf32> to vector<2x1xf32>
    %71 = vector.broadcast %70 : vector<2x1xf32> to vector<2x512xf32>
    %72 = arith.cmpf oge, %59, %71 : vector<2x512xf32>
    %73 = vector.broadcast %c512_i32 : i32 to vector<2x512xi32>
    %74 = arith.select %72, %61, %73 : vector<2x512xi1>, vector<2x512xi32>
    %cst_14 = arith.constant dense<2147483647> : vector<2xi32>
    %75 = vector.multi_reduction <minsi>, %74, %cst_14 [1] : vector<2x512xi32> to vector<2xi32>
    %76 = vector.shape_cast %75 : vector<2xi32> to vector<2x1xi32>
    %77 = vector.broadcast %76 : vector<2x1xi32> to vector<2x512xi32>
    %78 = arith.cmpi eq, %1, %77 : vector<2x512xi32>
    %79 = vector.broadcast %cst_2 : f32 to vector<2x512xf32>
    %80 = arith.select %78, %79, %59 : vector<2x512xi1>, vector<2x512xf32>
    %81 = vector.broadcast %c512_i32 : i32 to vector<2x512xi32>
    %82 = arith.select %78, %81, %61 : vector<2x512xi1>, vector<2x512xi32>
    %83 = vector.broadcast %c3_i32 : i32 to vector<2x128xi32>
    %84 = arith.cmpi eq, %2, %83 : vector<2x128xi32>
    %85 = vector.shape_cast %76 : vector<2x1xi32> to vector<2x1xi32>
    %86 = vector.broadcast %85 : vector<2x1xi32> to vector<2x128xi32>
    %87 = arith.select %84, %86, %66 : vector<2x128xi1>, vector<2x128xi32>
    %c0_i32_15 = arith.constant 0 : i32
    %88 = arith.cmpi eq, %c3_i32, %c0_i32_15 : i32
    %89 = arith.select %88, %70, %68 : vector<2x1xf32>
    %c4_i32 = arith.constant 4 : i32
    %c0_16 = arith.constant 0 : index
    %c0_17 = arith.constant 0 : index
    %90 = vector.load %arg3[%c0_16, %c0_17] : memref<2x128xi32, #tpu.memory_space<vmem>>, vector<2x128xi32>
    tpu.vector_store %arg3[%c0_16, %c0_17], %87 {strides = array<i32>} : memref<2x128xi32, #tpu.memory_space<vmem>>, vector<2x128xi32>,
    %91 = vector.broadcast %70 : vector<2x1xf32> to vector<2x512xf32>
    %92 = arith.cmpf oge, %0, %91 : vector<2x512xf32>
    %cst_18 = arith.constant 1.250000e+00 : f32
    %93 = vector.broadcast %cst_18 : f32 to vector<2x1xf32>
    %94 = arith.mulf %89, %93 : vector<2x1xf32>
    %cst_19 = arith.constant 1.250000e+00 : f32
    %95 = vector.broadcast %cst_19 : f32 to vector<2x512xf32>
    %96 = arith.mulf %0, %95 : vector<2x512xf32>
    %97 = vector.broadcast %94 : vector<2x1xf32> to vector<2x512xf32>
    %98 = arith.subf %96, %97 : vector<2x512xf32>
    %99 = math.exp %98 : vector<2x512xf32>
    %cst_20 = arith.constant 0.000000e+00 : f32
    %100 = vector.broadcast %cst_20 : f32 to vector<2x512xf32>
    %101 = arith.select %92, %99, %100 : vector<2x512xi1>, vector<2x512xf32>
    %cst_21 = arith.constant dense<0.000000e+00> : vector<2xf32>
    %102 = vector.multi_reduction <add>, %101, %cst_21 [1] : vector<2x512xf32> to vector<2xf32>
    %103 = vector.shape_cast %102 : vector<2xf32> to vector<2x1xf32>
    %104 = tpu.reciprocal %103 {approx = true} : vector<2x1xf32> -> vector<2x1xf32>
    %105 = arith.mulf %103, %104 : vector<2x1xf32>
    %cst_22 = arith.constant 2.000000e+00 : f32
    %106 = vector.broadcast %cst_22 : f32 to vector<2x1xf32>
    %107 = arith.subf %106, %105 : vector<2x1xf32>
    %108 = arith.mulf %104, %107 : vector<2x1xf32>
    %109 = arith.mulf %103, %108 : vector<2x1xf32>
    %cst_23 = arith.constant 2.000000e+00 : f32
    %110 = vector.broadcast %cst_23 : f32 to vector<2x1xf32>
    %111 = arith.subf %110, %109 : vector<2x1xf32>
    %112 = arith.mulf %108, %111 : vector<2x1xf32>
    %113 = vector.broadcast %112 : vector<2x1xf32> to vector<2x512xf32>
    %114 = arith.mulf %101, %113 : vector<2x512xf32>
    %c0_24 = arith.constant 0 : index
    %c0_25 = arith.constant 0 : index
    %115 = vector.load %arg2[%c0_24, %c0_25] : memref<2x512xf32, #tpu.memory_space<vmem>>, vector<2x512xf32>
    tpu.vector_store %arg2[%c0_24, %c0_25], %114 {strides = array<i32>} : memref<2x512xf32, #tpu.memory_space<vmem>>, vector<2x512xf32>,
    return
  }
  func.func @transform_0(%arg0: i32) -> (i32, i32) {
    %c0_i32 = arith.constant 0 : i32
    %c0_i32_0 = arith.constant 0 : i32
    return %arg0, %c0_i32 : i32, i32
  }
  func.func @transform_1(%arg0: i32) -> (i32, i32) {
    %c0_i32 = arith.constant 0 : i32
    %c0_i32_0 = arith.constant 0 : i32
    return %arg0, %c0_i32 : i32, i32
  }
  func.func @transform_2(%arg0: i32) -> (i32, i32) {
    %c0_i32 = arith.constant 0 : i32
    %c0_i32_0 = arith.constant 0 : i32
    return %arg0, %c0_i32 : i32, i32
  }
}

</mosaic_0001>

<bundles_post_ra>
// kernel: tpu_custom_call.1
= control target key start
LH: loop header
LB: loop body
LE: loop exit
PB: predicated region body
PF: predicated region fallthrough
CT: control target
= control target key end

     0   :  { %8 = vsyncpa [#allocation3], 0  ;;  %s633_s0 = inlined_call_operand.hbm [shape: f32[2,512], index: 0, kind: input, shape index: {}]   ;;  %s634_s1 = inlined_call_operand.hbm [shape: f32[2,512], index: 1, kind: output, shape index: {0}]   ;;  %s635_s2 = inlined_call_operand.hbm [shape: s32[2,128], index: 2, kind: output, shape index: {1}]  }
   0x1   :  { %9 = vsyncpa [#allocation4], 0 }
   0x2   :  { %10 = vsyncpa [#allocation7], 0  ;;  %s16_s11 = sshll.u32 %s633_s0, 4  ;;  %s446_s12 = smov [#allocation2]   ;;  %s17_s11 = int_to_ptr.hbm [resolvable:$true] %s16_s11 }
   0x3   :  { %s18_s13 = sshll.u32 %s446_s12, 4  ;;  %s19_s13 = int_to_ptr.vmem [resolvable:$true] %s18_s13 }
   0x4   :  { %21 = dma.hbm_to_vmem [thread:$0]  %s17_s11, 128, %s19_s13, [#allocation3]  }
   0x5   :  { %440 = dma.done.wait [#allocation3], 128  }
   0x6   :  { %441 = vsyncadd [#allocation3], 4294967168  ;;  %v468_v0 = vld [vmem:[#allocation2] sm:$0xff]  ;;  %vm42_vm0 = vcmask 1041408   ;;  %v27_v12 = vlaneseq  ;;  %v447_v17 = vmov 269488144  }
   0x7   :  { %33 = vst [vmem:[#allocation1] ss:$4 sm:$0xff] %v468_v0  ;;  %v54_v18 = vunpack.c.l.s4 %v447_v17  ;;  %vm63_vm1 = vcmask 1045508   ;;  %vm65_vm2 = vcmask 1043456   ;;  %s448_s0 = smov [#allocation5]   ;;  %s334_s17 = sshll.u32 %s634_s1, 4  ;;  %s335_s17 = int_to_ptr.hbm [resolvable:$true] %s334_s17 }
   0x8   :  { %v475_v13 = vand.u32 127, %v27_v12  ;;  %s332_s14 = sshll.u32 %s448_s0, 4  ;;  %s449_s18 = smov [#allocation6]   ;;  %s333_s14 = int_to_ptr.vmem [resolvable:$true] %s332_s14 }
   0x9   :  { %v489_v22 = vunpack.c.0.s8 %v54_v18  ;;  %s343_s19 = sshll.u32 %s449_s18, 4  ;;  %s345_s22 = sshll.u32 %s635_s2, 4  ;;  %s344_s19 = int_to_ptr.vmem [resolvable:$true] %s343_s19  ;;  %s346_s22 = int_to_ptr.hbm [resolvable:$true] %s345_s22 }
   0xa   :  { %v478_v14 = vadd.s32 128, %v475_v13  ;;  %v481_v15 = vadd.s32 256, %v475_v13  ;;  %v484_v16 = vadd.s32 384, %v475_v13 }
   0xc   :  { %v59_v19 = vrot.slane %v478_v14, 6  ;;  %v60_v20 = vrot.slane %v481_v15, 4  ;;  %v61_v21 = vrot.slane %v484_v16, 2 }
   0xe   :  { %v34_v1 = vld.sshfl [vmem:[#allocation1] sm:$0xff pattern:$0x73625140]  ;;  %v35_v2 = vld.sshfl [vmem:[#allocation1 + $0x8] sm:$0xff pattern:$0x73625140]  ;;  %v62_v23 = vsel %vm42_vm0, %v475_v13, %v59_v19  ;;  %v64_v24 = vsel %vm63_vm1, %v60_v20, %v61_v21 }
   0xf   :  { %v36_v3 = vld.sshfl [vmem:[#allocation1 + $0x10] sm:$0xff pattern:$0x73625140]  ;;  %v37_v4 = vld.sshfl [vmem:[#allocation1 + $0x18] sm:$0xff pattern:$0x73625140]  ;;  %v66_v26 = vsel %vm65_vm2, %v62_v23, %v64_v24 }
  0x10   :  { %v43_v5 = vsel %vm42_vm0, %v34_v1, -inf  ;;  %v44_v6 = vsel %vm42_vm0, %v35_v2, -inf  ;;  %v45_v7 = vsel %vm42_vm0, %v36_v3, -inf  ;;  %v46_v8 = vsel %vm42_vm0, %v37_v4, -inf }
  0x11   :  { %v47_v9 = vmax.f32 %v43_v5, %v44_v6  ;;  %v48_v10 = vmax.f32 %v45_v7, %v46_v8 }
  0x13   :  { %v49_v11 = vmax.f32 %v47_v9, %v48_v10 }
  0x15   :  { %50 = vmax.xlane.f32.xlu0 %v49_v11 }
  0x88   :  { %v493_v25 = vpop.xlane.xlu0 %50 }
  0x89   :  { %v56_v27 = vperm.slane %v493_v25, %v489_v22 }
  0x8b   :  { %vm58_vm3 = vcmp.ge.f32.partialorder %v468_v0, %v56_v27 }
  0x8c   :  { %v67_v28 = vsel %vm58_vm3, %v66_v26, 512 }
  0x8d   :  { %68 = vst [vmem:[#allocation1] ss:$4 sm:$0xff] %v67_v28 }
  0x94   :  { %v69_v29 = vld.sshfl [vmem:[#allocation1] sm:$0xff pattern:$0x73625140]  ;;  %v70_v30 = vld.sshfl [vmem:[#allocation1 + $0x8] sm:$0xff pattern:$0x73625140] }
  0x95   :  { %v71_v31 = vld.sshfl [vmem:[#allocation1 + $0x10] sm:$0xff pattern:$0x73625140]  ;;  %v72_v32 = vld.sshfl [vmem:[#allocation1 + $0x18] sm:$0xff pattern:$0x73625140] }
  0x96   :  { %v73_v33 = vsel %vm42_vm0, %v69_v29, 2147483647  ;;  %v74_v34 = vsel %vm42_vm0, %v70_v30, 2147483647  ;;  %v75_v35 = vsel %vm42_vm0, %v71_v31, 2147483647 }
  0x97   :  { %v76_v36 = vsel %vm42_vm0, %v72_v32, 2147483647  ;;  %vm77_vm4 = vcmp.lt.s32.totalorder %v73_v33, %v74_v34  ;;  %101 = vst [vmem:[#allocation1] ss:$4 sm:$0xff] %v468_v0 }
  0x98   :  { %v78_v37 = vsel %vm77_vm4, %v73_v33, %v74_v34  ;;  %vm79_vm5 = vcmp.lt.s32.totalorder %v75_v35, %v76_v36 }
  0x99   :  { %v80_v38 = vsel %vm79_vm5, %v75_v35, %v76_v36  ;;  %vm118_vm5 = vcmp.eq.s32.totalorder %v475_v13, 0 }
  0x9a   :  { %vm81_vm6 = vcmp.lt.s32.totalorder %v78_v37, %v80_v38 }
  0x9b   :  { %v82_v39 = vsel %vm81_vm6, %v78_v37, %v80_v38  ;;  %vm173_vm6 = vcmp.eq.s32.totalorder %v475_v13, 1 }
  0x9c   :  { %v84_v40 = vshra.s32 %v82_v39, 16  ;;  %v83_v42 = vand.u32 65535, %v82_v39 }
  0x9e   :  { %v86_v41 = vcvt.s32.f32 %v84_v40  ;;  %v85_v44 = vcvt.s32.f32 %v83_v42  ;;  %v102_v50 = vld.sshfl [vmem:[#allocation1] sm:$0xff pattern:$0x73625140]  ;;  %v103_v51 = vld.sshfl [vmem:[#allocation1 + $0x8] sm:$0xff pattern:$0x73625140] }
  0x9f   :  { %v104_v53 = vld.sshfl [vmem:[#allocation1 + $0x10] sm:$0xff pattern:$0x73625140]  ;;  %v105_v54 = vld.sshfl [vmem:[#allocation1 + $0x18] sm:$0xff pattern:$0x73625140] }
  0xa0   :  { %87 = vmin.xlane.f32.xlu0 %v86_v41 }
 0x113   :  { %v88_v43 = vpop.xlane.xlu0 %87 }
 0x114   :  { %vm89_vm7 = vcmp.eq.f32.partialorder %v86_v41, %v88_v43  ;;  %v94_v46 = vcvt.f32.s32 %v88_v43 }
 0x115   :  { %v90_v45 = vsel %vm89_vm7, %v85_v44, inf }
 0x116   :  { %91 = vmin.xlane.f32.xlu1 %v90_v45  ;;  %v95_v48 = vshll.u32 %v94_v46, 16 }
 0x189   :  { %v92_v47 = vpop.xlane.xlu1 %91 }
 0x18a   :  { %v93_v49 = vcvt.f32.s32 %v92_v47 }
 0x18c   :  { %v503_v52 = vadd.s32 %v95_v48, %v93_v49 }
 0x18e   :  { %vm97_vm8 = vcmp.eq.s32.totalorder %v475_v13, %v503_v52  ;;  %vm98_vm9 = vcmp.eq.s32.totalorder %v478_v14, %v503_v52  ;;  %vm99_vm10 = vcmp.eq.s32.totalorder %v481_v15, %v503_v52  ;;  %vm100_vm11 = vcmp.eq.s32.totalorder %v484_v16, %v503_v52 }
 0x18f   :  { %v110_v55 = vsel %vm97_vm8, -inf, %v102_v50  ;;  %v111_v56 = vsel %vm98_vm9, -inf, %v103_v51  ;;  %v112_v57 = vsel %vm99_vm10, -inf, %v104_v53  ;;  %v113_v58 = vsel %vm100_vm11, -inf, %v105_v54 }
 0x190   :  { %v120_v59 = vsel %vm42_vm0, %v110_v55, -inf  ;;  %v121_v60 = vsel %vm42_vm0, %v111_v56, -inf  ;;  %v122_v61 = vsel %vm42_vm0, %v112_v57, -inf  ;;  %v123_v62 = vsel %vm42_vm0, %v113_v58, -inf }
 0x191   :  { %v124_v63 = vmax.f32 %v120_v59, %v121_v60  ;;  %v125_v1 = vmax.f32 %v122_v61, %v123_v62  ;;  %v114_v3 = vsel %vm97_vm8, 512, %v475_v13  ;;  %v115_v4 = vsel %vm98_vm9, 512, %v478_v14 }
 0x192   :  { %v116_v5 = vsel %vm99_vm10, 512, %v481_v15  ;;  %v117_v6 = vsel %vm100_vm11, 512, %v484_v16  ;;  %v119_v46 = vsel %vm118_vm5, %v503_v52, 0 }
 0x193   :  { %v126_v2 = vmax.f32 %v124_v63, %v125_v1 }
 0x195   :  { %127 = vmax.xlane.f32.xlu1 %v126_v2 }
 0x208   :  { %v128_v7 = vpop.xlane.xlu1 %127 }
 0x209   :  { %vm129_vm12 = vcmp.ge.f32.partialorder %v110_v55, %v128_v7  ;;  %vm130_vm13 = vcmp.ge.f32.partialorder %v111_v56, %v128_v7  ;;  %vm131_vm14 = vcmp.ge.f32.partialorder %v112_v57, %v128_v7  ;;  %vm132_vm15 = vcmp.ge.f32.partialorder %v113_v58, %v128_v7 }
 0x20a   :  { %v133_v8 = vsel %vm129_vm12, %v114_v3, 512  ;;  %v134_v9 = vsel %vm130_vm13, %v115_v4, 512  ;;  %v135_v10 = vsel %vm131_vm14, %v116_v5, 512  ;;  %v136_v11 = vsel %vm132_vm15, %v117_v6, 512 }
 0x20b   :  { %v137_v12 = vsel %vm42_vm0, %v133_v8, 2147483647  ;;  %v138_v17 = vsel %vm42_vm0, %v134_v9, 2147483647  ;;  %v139_v18 = vsel %vm42_vm0, %v135_v10, 2147483647 }
 0x20c   :  { %v140_v19 = vsel %vm42_vm0, %v136_v11, 2147483647  ;;  %vm141_vm1 = vcmp.lt.s32.totalorder %v137_v12, %v138_v17 }
 0x20d   :  { %v142_v20 = vsel %vm141_vm1, %v137_v12, %v138_v17  ;;  %vm143_vm2 = vcmp.lt.s32.totalorder %v139_v18, %v140_v19 }
 0x20e   :  { %v144_v21 = vsel %vm143_vm2, %v139_v18, %v140_v19 }
 0x20f   :  { %vm145_vm3 = vcmp.lt.s32.totalorder %v142_v20, %v144_v21 }
 0x210   :  { %v146_v23 = vsel %vm145_vm3, %v142_v20, %v144_v21 }
 0x211   :  { %v148_v24 = vshra.s32 %v146_v23, 16  ;;  %v147_v27 = vand.u32 65535, %v146_v23 }
 0x213   :  { %v150_v26 = vcvt.s32.f32 %v148_v24  ;;  %v149_v29 = vcvt.s32.f32 %v147_v27 }
 0x215   :  { %151 = vmin.xlane.f32.xlu2 %v150_v26 }
 0x288   :  { %v152_v28 = vpop.xlane.xlu2 %151 }
 0x289   :  { %vm153_vm4 = vcmp.eq.f32.partialorder %v150_v26, %v152_v28  ;;  %v158_v31 = vcvt.f32.s32 %v152_v28 }
 0x28a   :  { %v154_v30 = vsel %vm153_vm4, %v149_v29, inf  ;;  %vm228_vm4 = vcmp.eq.s32.totalorder %v475_v13, 2 }
 0x28b   :  { %155 = vmin.xlane.f32.xlu2 %v154_v30  ;;  %v159_v33 = vshll.u32 %v158_v31, 16  ;;  %v281_v31 = vmul.f32 1.25, %v493_v25 }
 0x2fe   :  { %v156_v32 = vpop.xlane.xlu2 %155 }
 0x2ff   :  { %v157_v34 = vcvt.f32.s32 %v156_v32  ;;  %v282_v32 = vmul.f32 1.25, %v468_v0 }
 0x301   :  { %v160_v35 = vadd.s32 %v159_v33, %v157_v34  ;;  %v287_v33 = vperm.slane %v281_v31, %v489_v22 }
 0x303   :  { %vm161_vm7 = vcmp.eq.s32.totalorder %v475_v13, %v160_v35  ;;  %vm162_vm8 = vcmp.eq.s32.totalorder %v478_v14, %v160_v35  ;;  %vm163_vm9 = vcmp.eq.s32.totalorder %v481_v15, %v160_v35  ;;  %vm164_vm10 = vcmp.eq.s32.totalorder %v484_v16, %v160_v35 }
 0x304   :  { %v165_v36 = vsel %vm161_vm7, -inf, %v110_v55  ;;  %v166_v37 = vsel %vm162_vm8, -inf, %v111_v56  ;;  %v167_v38 = vsel %vm163_vm9, -inf, %v112_v57  ;;  %v168_v39 = vsel %vm164_vm10, -inf, %v113_v58 }
 0x305   :  { %v175_v40 = vsel %vm42_vm0, %v165_v36, -inf  ;;  %v176_v41 = vsel %vm42_vm0, %v166_v37, -inf  ;;  %v177_v42 = vsel %vm42_vm0, %v167_v38, -inf  ;;  %v178_v43 = vsel %vm42_vm0, %v168_v39, -inf }
 0x306   :  { %v179_v44 = vmax.f32 %v175_v40, %v176_v41  ;;  %v180_v45 = vmax.f32 %v177_v42, %v178_v43  ;;  %v174_v47 = vsel %vm173_vm6, %v160_v35, %v119_v46  ;;  %v169_v49 = vsel %vm161_vm7, 512, %v114_v3 }
 0x307   :  { %v170_v50 = vsel %vm162_vm8, 512, %v115_v4  ;;  %v171_v51 = vsel %vm163_vm9, 512, %v116_v5  ;;  %v172_v53 = vsel %vm164_vm10, 512, %v117_v6  ;;  %v289_v34 = vsub.f32 %v282_v32, %v287_v33 }
 0x308   :  { %v181_v48 = vmax.f32 %v179_v44, %v180_v45 }
 0x309   :  { %v290_v35 = vmul.f32 1.442695, %v289_v34 }
 0x30a   :  { %182 = vmax.xlane.f32.xlu0 %v181_v48 }
 0x30b   :  { %364 = vpow2.f32 %v290_v35 }
 0x37d   :  { %v183_v54 = vpop.xlane.xlu0 %182 }
 0x37e   :  { %vm184_vm11 = vcmp.ge.f32.partialorder %v165_v36, %v183_v54  ;;  %vm185_vm12 = vcmp.ge.f32.partialorder %v166_v37, %v183_v54  ;;  %vm186_vm13 = vcmp.ge.f32.partialorder %v167_v38, %v183_v54  ;;  %vm187_vm14 = vcmp.ge.f32.partialorder %v168_v39, %v183_v54 }
 0x37f   :  { %v188_v52 = vsel %vm184_vm11, %v169_v49, 512  ;;  %v189_v55 = vsel %vm185_vm12, %v170_v50, 512  ;;  %v190_v56 = vsel %vm186_vm13, %v171_v51, 512  ;;  %v191_v57 = vsel %vm187_vm14, %v172_v53, 512 }
 0x380   :  { %v192_v58 = vsel %vm42_vm0, %v188_v52, 2147483647  ;;  %v193_v59 = vsel %vm42_vm0, %v189_v55, 2147483647  ;;  %v194_v60 = vsel %vm42_vm0, %v190_v56, 2147483647 }
 0x381   :  { %v195_v61 = vsel %vm42_vm0, %v191_v57, 2147483647  ;;  %vm196_vm15 = vcmp.lt.s32.totalorder %v192_v58, %v193_v59 }
 0x382   :  { %v197_v62 = vsel %vm196_vm15, %v192_v58, %v193_v59  ;;  %vm198_vm1 = vcmp.lt.s32.totalorder %v194_v60, %v195_v61 }
 0x383   :  { %v199_v63 = vsel %vm198_vm1, %v194_v60, %v195_v61 }
 0x384   :  { %vm200_vm2 = vcmp.lt.s32.totalorder %v197_v62, %v199_v63 }
 0x385   :  { %v201_v1 = vsel %vm200_vm2, %v197_v62, %v199_v63 }
 0x386   :  { %v203_v2 = vshra.s32 %v201_v1, 16  ;;  %v202_v4 = vand.u32 65535, %v201_v1 }
 0x388   :  { %v205_v3 = vcvt.s32.f32 %v203_v2  ;;  %v204_v6 = vcvt.s32.f32 %v202_v4 }
 0x38a   :  { %206 = vmin.xlane.f32.xlu1 %v205_v3 }
 0x3fd   :  { %v207_v5 = vpop.xlane.xlu1 %206 }
 0x3fe   :  { %vm208_vm3 = vcmp.eq.f32.partialorder %v205_v3, %v207_v5  ;;  %v213_v8 = vcvt.f32.s32 %v207_v5 }
 0x3ff   :  { %v209_v7 = vsel %vm208_vm3, %v204_v6, inf }
 0x400   :  { %210 = vmin.xlane.f32.xlu2 %v209_v7  ;;  %v214_v10 = vshll.u32 %v213_v8, 16 }
 0x473   :  { %v211_v9 = vpop.xlane.xlu2 %210 }
 0x474   :  { %v212_v11 = vcvt.f32.s32 %v211_v9 }
 0x476   :  { %v215_v12 = vadd.s32 %v214_v10, %v212_v11 }
 0x478   :  { %vm216_vm5 = vcmp.eq.s32.totalorder %v475_v13, %v215_v12  ;;  %vm217_vm6 = vcmp.eq.s32.totalorder %v478_v14, %v215_v12  ;;  %vm218_vm7 = vcmp.eq.s32.totalorder %v481_v15, %v215_v12  ;;  %vm219_vm8 = vcmp.eq.s32.totalorder %v484_v16, %v215_v12  ;;  %v365_v15 = vpop.eup %364 }
 0x479   :  { %v220_v17 = vsel %vm216_vm5, -inf, %v165_v36  ;;  %v221_v18 = vsel %vm217_vm6, -inf, %v166_v37  ;;  %v222_v19 = vsel %vm218_vm7, -inf, %v167_v38  ;;  %v223_v20 = vsel %vm219_vm8, -inf, %v168_v39 }
 0x47a   :  { %v230_v21 = vsel %vm42_vm0, %v220_v17, -inf  ;;  %v231_v23 = vsel %vm42_vm0, %v221_v18, -inf  ;;  %v232_v24 = vsel %vm42_vm0, %v222_v19, -inf  ;;  %v233_v26 = vsel %vm42_vm0, %v223_v20, -inf }
 0x47b   :  { %v234_v27 = vmax.f32 %v230_v21, %v231_v23  ;;  %v235_v28 = vmax.f32 %v232_v24, %v233_v26  ;;  %v601_v29 = vsel %vm228_vm4, %v215_v12, %v174_v47  ;;  %v224_v36 = vsel %vm216_vm5, 512, %v169_v49 }
 0x47c   :  { %v225_v37 = vsel %vm217_vm6, 512, %v170_v50  ;;  %v226_v38 = vsel %vm218_vm7, 512, %v171_v51  ;;  %v227_v39 = vsel %vm219_vm8, 512, %v172_v53 }
 0x47d   :  { %v236_v30 = vmax.f32 %v234_v27, %v235_v28 }
 0x47f   :  { %237 = vmax.xlane.f32.xlu0 %v236_v30 }
 0x4f2   :  { %v238_v25 = vpop.xlane.xlu0 %237 }
 0x4f3   :  { %vm239_vm9 = vcmp.ge.f32.partialorder %v220_v17, %v238_v25  ;;  %vm240_vm10 = vcmp.ge.f32.partialorder %v221_v18, %v238_v25  ;;  %vm241_vm11 = vcmp.ge.f32.partialorder %v222_v19, %v238_v25  ;;  %vm242_vm12 = vcmp.ge.f32.partialorder %v223_v20, %v238_v25 }
 0x4f4   :  { %v278_v40 = vperm.slane %v238_v25, %v489_v22  ;;  %v243_v41 = vsel %vm239_vm9, %v224_v36, 512  ;;  %v244_v42 = vsel %vm240_vm10, %v225_v37, 512  ;;  %v245_v43 = vsel %vm241_vm11, %v226_v38, 512 }
 0x4f5   :  { %v246_v44 = vsel %vm242_vm12, %v227_v39, 512  ;;  %v247_v14 = vsel %vm42_vm0, %v243_v41, 2147483647  ;;  %v248_v45 = vsel %vm42_vm0, %v244_v42, 2147483647 }
 0x4f6   :  { %vm280_vm13 = vcmp.ge.f32.partialorder %v468_v0, %v278_v40  ;;  %v249_v16 = vsel %vm42_vm0, %v245_v43, 2147483647  ;;  %v250_v46 = vsel %vm42_vm0, %v246_v44, 2147483647  ;;  %vm251_vm14 = vcmp.lt.s32.totalorder %v247_v14, %v248_v45 }
 0x4f7   :  { %v292_v47 = vsel %vm280_vm13, %v365_v15, 0.0  ;;  %v252_v48 = vsel %vm251_vm14, %v247_v14, %v248_v45  ;;  %vm253_vm15 = vcmp.lt.s32.totalorder %v249_v16, %v250_v46 }
 0x4f8   :  { %294 = vst [vmem:[#allocation1] ss:$4 sm:$0xff] %v292_v47  ;;  %v254_v49 = vsel %vm253_vm15, %v249_v16, %v250_v46 }
 0x4f9   :  { %vm255_vm1 = vcmp.lt.s32.totalorder %v252_v48, %v254_v49 }
 0x4fa   :  { %v256_v50 = vsel %vm255_vm1, %v252_v48, %v254_v49 }
 0x4fb   :  { %v258_v51 = vshra.s32 %v256_v50, 16  ;;  %v257_v63 = vand.u32 65535, %v256_v50 }
 0x4fd   :  { %v260_v53 = vcvt.s32.f32 %v258_v51  ;;  %v259_v2 = vcvt.s32.f32 %v257_v63 }
 0x4ff   :  { %261 = vmin.xlane.f32.xlu1 %v260_v53  ;;  %v295_v54 = vld.sshfl [vmem:[#allocation1] sm:$0xff pattern:$0x73625140]  ;;  %v296_v52 = vld.sshfl [vmem:[#allocation1 + $0x8] sm:$0xff pattern:$0x73625140] }
 0x500   :  { %v297_v55 = vld.sshfl [vmem:[#allocation1 + $0x10] sm:$0xff pattern:$0x73625140]  ;;  %v303_v0 = vsel %vm42_vm0, %v295_v54, 0.0  ;;  %v304_v56 = vsel %vm42_vm0, %v296_v52, 0.0 }
 0x501   :  { %v298_v57 = vld.sshfl [vmem:[#allocation1 + $0x18] sm:$0xff pattern:$0x73625140]  ;;  %v305_v58 = vadd.f32 %v304_v56, %v303_v0  ;;  %v306_v59 = vsel %vm42_vm0, %v297_v55, 0.0 }
 0x502   :  { %v308_v61 = vsel %vm42_vm0, %v298_v57, 0.0  ;;  %vm271_vm0 = vcmp.eq.s32.totalorder %v475_v13, 3 }
 0x503   :  { %v307_v60 = vadd.f32 %v306_v59, %v305_v58 }
 0x505   :  { %v309_v62 = vadd.f32 %v308_v61, %v307_v60 }
 0x507   :  { %310 = vadd.xlane.f32.xlu2 %v309_v62 }
 0x572   :  { %v262_v1 = vpop.xlane.xlu1 %261 }
 0x573   :  { %vm263_vm2 = vcmp.eq.f32.partialorder %v260_v53, %v262_v1  ;;  %v268_v18 = vcvt.f32.s32 %v262_v1 }
 0x574   :  { %v264_v3 = vsel %vm263_vm2, %v259_v2, inf }
 0x575   :  { %265 = vmin.xlane.f32.xlu0 %v264_v3  ;;  %v269_v20 = vshll.u32 %v268_v18, 16 }
 0x57a   :  { %v311_v4 = vpop.xlane.xlu2 %310 }
 0x57b   :  { %366 = vrcp.f32 %v311_v4 }
 0x581   :  { %v367_v5 = vpop.eup %366 }
 0x582   :  { %v313_v6 = vmul.f32 %v367_v5, %v311_v4 }
 0x584   :  { %v314_v7 = vsub.f32 2.0, %v313_v6 }
 0x586   :  { %v315_v8 = vmul.f32 %v367_v5, %v314_v7 }
 0x588   :  { %v316_v9 = vmul.f32 %v315_v8, %v311_v4 }
 0x58a   :  { %v317_v10 = vsub.f32 2.0, %v316_v9 }
 0x58c   :  { %v318_v11 = vmul.f32 %v317_v10, %v315_v8 }
 0x58e   :  { %v323_v12 = vperm.slane %v318_v11, %v489_v22 }
 0x590   :  { %v325_v17 = vmul.f32 %v323_v12, %v292_v47 }
 0x592   :  { %326 = vst [vmem:[#allocation5] sm:$0xff] %v325_v17 }
 0x593   :  { %337 = dma.vmem_to_hbm [thread:$0]  %s333_s14, 128, %s335_s17, [#allocation4]  }
 0x5e8   :  { %v266_v19 = vpop.xlane.xlu0 %265 }
 0x5e9   :  { %v267_v21 = vcvt.f32.s32 %v266_v19 }
 0x5eb   :  { %v270_v23 = vadd.s32 %v269_v20, %v267_v21 }
 0x5ed   :  { %v272_v22 = vsel %vm271_vm0, %v270_v23, %v601_v29 }
 0x5ee   :  { %273 = vst [vmem:[#allocation6] sm:$0x3] %v272_v22 }
 0x5ef   :  { %348 = dma.vmem_to_hbm [thread:$0]  %s344_s19, 32, %s346_s22, [#allocation7]  }
 0x5f0   :  { %442 = dma.done.wait [#allocation4], 128  }
 0x5f1   :  { %443 = vsyncadd [#allocation4], 4294967168 }
 0x5f2   :  { %444 = dma.done.wait [#allocation7], 32  }
 0x5f3   :  { %445 = vsyncadd [#allocation7], 4294967264 }
 0x5f4   :  { %357 = vsyncpa [#allocation3], 1 }
 0x5f5   :  { %358 = vsyncpa [#allocation4], 1 }
 0x5f6   :  { %359 = vsyncpa [#allocation7], 1 }

</bundles_post_ra>
